<compile_context>
chip_gen: v5e
topology: v5e:2x2
jax: 0.10.0
libtpu: 0.0.40
codegen_flags: <defaults>
</compile_context>

<pallas_src>
import functools

import jax
import jax.numpy as jnp
from jax.experimental import pallas as pl
from jax.experimental.pallas import tpu as pltpu

_LANES = 128
_ROW_ALIGN = 32                      # native u8 sublane tile (also a multiple of f32's 8)
_BUDGET_BYTES = 10 * 1024 * 1024     # per (u8-in + f32-out) buffer set; x2 for double buffering
_FLOOR_ELEMS = 256 * 1024            # >= ~1 MiB of f32 written per grid step
_MIN_STEPS = 8                       # >= 4 steps per TensorCore on v7x


def _to_tensor_kernel(x_ref, o_ref, *, scale):
    # Elementwise hot path: uint8 -> float32, divide by 255 ([0, 1] range).
    v = x_ref[...].astype(jnp.float32) / 255.0
    if scale != 1.0:  # module attribute; torchvision ToTensor itself never scales
        v = v * scale
    o_ref[...] = v


def _round_up(x, m):
    return ((x + m - 1) // m) * m


def _choose_block_rows(rows, w_useful, w_padded, max_block_rows=None):
    """Row-tile for a (rows, w_useful) streaming view (VMEM pads rows to w_padded lanes)."""
    if max_block_rows is not None and max_block_rows >= rows:
        max_block_rows = None
    if rows <= _ROW_ALIGN and max_block_rows is None:
        return rows                                   # single full-array block (always legal)
    # VMEM cap: 5 B/elem (1 B u8 in + 4 B f32 out) on the lane-padded width.
    budget_rows = max(_ROW_ALIGN,
                      (_BUDGET_BYTES // (5 * w_padded)) // _ROW_ALIGN * _ROW_ALIGN)
    # Per-step floor so the ~0.35 us grid-step overhead stays amortized.
    floor_rows = _round_up(max(1, _FLOOR_ELEMS // max(w_useful, 1)), _ROW_ALIGN)
    # Enough steps for double-buffering to overlap the read and writeback streams.
    steps_rows = _round_up(pl.cdiv(rows, _MIN_STEPS), _ROW_ALIGN)
    br = min(budget_rows, max(steps_rows, floor_rows))
    if max_block_rows is not None:
        br = min(br, max(_ROW_ALIGN, (max_block_rows // _ROW_ALIGN) * _ROW_ALIGN))
    return rows if br >= rows else br


def _stream_scale(x2d, block_rows, scale):
    rows, width = x2d.shape
    grid = (pl.cdiv(rows, block_rows),)
    return pl.pallas_call(
        functools.partial(_to_tensor_kernel, scale=float(scale)),
        out_shape=jax.ShapeDtypeStruct((rows, width), jnp.float32),
        grid=grid,
        in_specs=[pl.BlockSpec((block_rows, width), lambda i: (i, 0))],
        out_specs=pl.BlockSpec((block_rows, width), lambda i: (i, 0)),
        compiler_params=pltpu.CompilerParams(
            dimension_semantics=("parallel",),
            vmem_limit_bytes=32 * 1024 * 1024,
        ),
    )(x2d)


@functools.partial(jax.jit, static_argnames=("scale", "max_block_rows"))
def pytorch_to_tensor(x_hwc_u8, scale: float = 1.0, max_block_rows=None):
    """JAX/Pallas equivalent of PytorchtoTensor.forward (ToTensor on uint8 HWC).

    Args:
      x_hwc_u8:       uint8 image of shape (H, W, C).
      scale:          module attribute (unused by the PyTorch forward); applied
                      as a multiplicative constant only if != 1.0.
      max_block_rows: optional cap on the row-tile (testing / tuning knob).
    Returns:
      float32 array of shape (C, H, W) with values in [0, 1].
    """
    H, W, C = x_hwc_u8.shape
    n = C * H * W

    # Channel de-interleave on the cheap uint8 side (1 B/elem); the f32 result
    # is then written exactly once, already in CHW order.
    x_chw_u8 = jnp.transpose(x_hwc_u8, (2, 0, 1))

    if n % _LANES == 0:
        # Perfectly lane-dense streaming view: unmasked 128-lane stores.
        rows = n // _LANES
        x2d = x_chw_u8.reshape(rows, _LANES)
        block_rows = _choose_block_rows(rows, _LANES, _LANES, max_block_rows)
    else:
        # Exact (C*H, W) view: no pad, no f32 un-pad slice; the partial last
        # vreg of each row is a masked store handled by Pallas.
        rows = C * H
        x2d = x_chw_u8.reshape(rows, W)
        block_rows = _choose_block_rows(rows, W, _round_up(W, _LANES), max_block_rows)

    out2d = _stream_scale(x2d, block_rows, scale)
    # Free reshape: data is already CHW-contiguous.
    return out2d.reshape(C, H, W)


if __name__ == "__main__":
    key = jax.random.PRNGKey(0)

    # (shape, max_block_rows) pairs; max_block_rows forces multi-block grids on
    # small test images so partial / masked blocks get exercised.
    cases = [
        ((16, 16, 3), None),     # lane-dense path, tiny single block
        ((32, 48, 3), None),     # lane-dense path, full-array single block
        ((10, 10, 3), None),     # (C*H, W) path, W < 128 -> masked lane stores
        ((66, 33, 3), 64),       # (C*H, W) path, 4-step grid with partial last block
        ((40, 128, 3), 32),      # lane-dense path, 4-step grid with partial last block
        ((224, 224, 3), None),   # realistic image, default tiling (single block)
    ]

    for idx, ((H, W, C), mbr) in enumerate(cases):
        k = jax.random.fold_in(key, idx)
        x_u8 = jax.random.randint(
            k, (H, W, C), 0, 256, dtype=jnp.int32
        ).astype(jnp.uint8)

        out = jax.block_until_ready(
            pytorch_to_tensor(x_u8, scale=1.0, max_block_rows=mbr)
        )

        # Reference check (plain JAX): ToTensor semantics.
        ref = jnp.transpose(x_u8.astype(jnp.float32) / 255.0, (2, 0, 1))
        assert out.shape == (C, H, W), (out.shape, (C, H, W))
        assert out.dtype == jnp.float32, out.dtype
        assert jnp.allclose(out, ref, atol=1e-7), f"mismatch vs reference for {(H, W, C)}"

    print("KERNEL_OK")
</pallas_src>

<mosaic_0001>
module attributes {stable_mosaic.version = 11 : i64} {
  func.func @_to_tensor_kernel(%arg0: i32, %arg1: memref<6x128xi8, #tpu.memory_space<vmem>>, %arg2: memref<6x128xf32, #tpu.memory_space<vmem>>) attributes {dimension_semantics = [#tpu.dimension_semantics<parallel>], iteration_bounds = array<i64: 1>, scalar_prefetch = 0 : i64, scratch_operands = 0 : i64, tpu.core_type = #tpu.core_type<tc>, window_params = [{transform_indices = @transform_0, window_bounds = array<i64: 6, 128>}, {transform_indices = @transform_1, window_bounds = array<i64: 6, 128>}]} {
    %c0 = arith.constant 0 : index
    %c0_0 = arith.constant 0 : index
    %0 = vector.load %arg1[%c0, %c0_0] : memref<6x128xi8, #tpu.memory_space<vmem>>, vector<6x128xi8>
    %1 = arith.uitofp %0 : vector<6x128xi8> to vector<6x128xf32>
    %cst = arith.constant 2.550000e+02 : f32
    %2 = vector.broadcast %cst : f32 to vector<6x128xf32>
    %3 = arith.divf %1, %2 : vector<6x128xf32>
    %c0_1 = arith.constant 0 : index
    %c0_2 = arith.constant 0 : index
    %4 = vector.load %arg2[%c0_1, %c0_2] : memref<6x128xf32, #tpu.memory_space<vmem>>, vector<6x128xf32>
    tpu.vector_store %arg2[%c0_1, %c0_2], %3 {strides = array<i32>} : memref<6x128xf32, #tpu.memory_space<vmem>>, vector<6x128xf32>,
    return
  }
  func.func @transform_0(%arg0: i32) -> (i32, i32) {
    %c0_i32 = arith.constant 0 : i32
    %c0_i32_0 = arith.constant 0 : i32
    return %arg0, %c0_i32 : i32, i32
  }
  func.func @transform_1(%arg0: i32) -> (i32, i32) {
    %c0_i32 = arith.constant 0 : i32
    %c0_i32_0 = arith.constant 0 : i32
    return %arg0, %c0_i32 : i32, i32
  }
}

</mosaic_0001>

<bundles_post_ra>
// kernel: pytorch_to_tensor.1
= control target key start
LH: loop header
LB: loop body
LE: loop exit
PB: predicated region body
PF: predicated region fallthrough
CT: control target
= control target key end

     0   :  { %v28_v0 = vmov 255.0   ;;  %s45_s0 = inlined_call_operand.vmem [shape: u8[6,128], index: 0, kind: input, shape index: {}]   ;;  %s46_s1 = inlined_call_operand.vmem [shape: f32[6,128], index: 1, kind: output, shape index: {}]  }
   0x1   :  { %26 = vrcp.f32 %v28_v0  ;;  %v8_v1 = vld [vmem:[%s45_s0] sm:$0x3] }
   0x2   :  { %v9_v2 = vunpack.c.0.s8 %v8_v1 }
   0x4   :  { %v10_v5 = vand.u32 255, %v9_v2 }
   0x6   :  { %v11_v8 = vcvt.s32.f32 %v10_v5 }
   0x7   :  { %v27_v3 = vpop.eup %26 }
   0x8   :  { %v13_v4 = vmul.f32 255.0, %v27_v3  ;;  %vm17_vm0 = vweird.f32 %v27_v3 }
   0xa   :  { %v14_v6 = vsub.f32 1.0, %v13_v4 }
   0xc   :  { %v15_v7 = vmul.f32 %v27_v3, %v14_v6 }
   0xe   :  { %v16_v9 = vadd.f32 %v27_v3, %v15_v7 }
  0x10   :  { %v18_v10 = vsel %vm17_vm0, %v27_v3, %v16_v9 }
  0x11   :  { %v19_v11 = vmul.f32 %v18_v10, %v11_v8 }
  0x13   :  { %20 = vst [vmem:[%s46_s1] sm:$0x3f] %v19_v11 }

</bundles_post_ra>
